<compile_context>
chip_gen: v5e
topology: v5e:2x2
jax: 0.10.0
libtpu: 0.0.40
codegen_flags: <defaults>
</compile_context>

<pallas_src>
import functools

import jax
import jax.numpy as jnp
import numpy as np
from jax.experimental import pallas as pl
from jax.experimental.pallas import tpu as pltpu


# --------------------------------------------------------------------------
# helpers
# --------------------------------------------------------------------------
def _round_up(x, m):
    return ((x + m - 1) // m) * m


def _choose_padded_n(n):
    """Padded node count for the similarity kernel.

    <= 1024 after 128-padding -> keep it (single lane-dense tile, minimal
    padding so the N^2 int8 writeback does not blow up quadratically).
    Otherwise pad to a 512 multiple so 512-wide tiles divide it exactly."""
    np128 = _round_up(n, 128)
    if np128 <= 1024:
        return np128
    return _round_up(n, 512)


def _vmem_limit(*buffer_bytes, headroom=8 << 20):
    """Scoped-VMEM request from explicit buffer arithmetic (+ headroom for
    compiler internal scratch), clamped to what any TPU generation has."""
    total = int(sum(buffer_bytes)) + headroom
    return max(16 << 20, min(total, 64 << 20))


# --------------------------------------------------------------------------
# Kernel 1: per-batch L2 normalization (-> padded bf16, channel-major) and
#           community means, all from the raw (C, N) slab (no host transpose).
# --------------------------------------------------------------------------
def _normalize_means_kernel(x_ref, an_ref, yn_ref, means_ref, *, c, n):
    # x_ref:    (C, N)   f32  raw channel-major features (full per-batch slab)
    # an_ref:   (Kp, N)  f32  one-hot / |community| assignment (zero pad rows)
    # yn_ref:   (Cp, Np) bf16 normalized features, channel-major, zero-padded
    # means_ref:(Kp, Cp) f32  community means, zero-padded
    cp, npad = yn_ref.shape

    x = x_ref[...]                                         # (C, N) f32
    ssq = jnp.sum(x * x, axis=0, keepdims=True)            # (1, N)
    # F.normalize(p=2, dim=1): x / max(||x||, 1e-12) == x * rsqrt(max(ssq, 1e-24))
    inv = jax.lax.rsqrt(jnp.maximum(ssq, 1e-24))

    if c < cp or n < npad:
        yn_ref[...] = jnp.zeros_like(yn_ref)               # pad region must be 0
    yn_ref[:c, :n] = (x * inv).astype(yn_ref.dtype)

    # community means: a_norm (Kp, N) . x (C, N) contracted over N -> (Kp, C)
    m = jax.lax.dot_general(
        an_ref[...], x,
        dimension_numbers=(((1,), (1,)), ((), ())),
        preferred_element_type=jnp.float32,
    )
    if c < means_ref.shape[1]:
        means_ref[...] = jnp.zeros_like(means_ref)
    means_ref[:, :c] = m


def normalize_and_means_pallas(features_bcn, a_norm, cp, npad):
    """features_bcn: (B, C, N) f32 (raw layout);  a_norm: (Kp, N) f32.
    Returns (yn (B, Cp, Np) bf16, means (B, Kp, Cp) f32)."""
    B, C, N = features_bcn.shape
    Kp = a_norm.shape[0]
    kernel = functools.partial(_normalize_means_kernel, c=C, n=N)
    vmem_limit = _vmem_limit(
        2 * C * N * 4,            # x blocks (double-buffered)
        2 * Kp * N * 4,           # a_norm blocks
        2 * cp * npad * 2,        # yn output blocks
        2 * Kp * cp * 4,          # means output blocks
        C * N * 4,                # f32 normalized intermediate
    )
    yn, means = pl.pallas_call(
        kernel,
        out_shape=(
            jax.ShapeDtypeStruct((B, cp, npad), jnp.bfloat16),
            jax.ShapeDtypeStruct((B, Kp, cp), jnp.float32),
        ),
        grid_spec=pltpu.PrefetchScalarGridSpec(
            num_scalar_prefetch=0,
            grid=(B,),
            in_specs=[
                pl.BlockSpec((pl.Squeezed(), C, N), lambda b: (b, 0, 0)),
                pl.BlockSpec((Kp, N), lambda b: (0, 0)),
            ],
            out_specs=(
                pl.BlockSpec((pl.Squeezed(), cp, npad), lambda b: (b, 0, 0)),
                pl.BlockSpec((pl.Squeezed(), Kp, cp), lambda b: (b, 0, 0)),
            ),
        ),
        compiler_params=pltpu.CompilerParams(
            dimension_semantics=("parallel",),
            vmem_limit_bytes=vmem_limit,
        ),
    )(features_bcn, a_norm)
    return yn, means


# --------------------------------------------------------------------------
# Kernel 2: cosine-similarity adjacency, thresholded at 0.5, int8 output.
#           Inputs are channel-major (Cp, *) bf16; contraction on dim 0.
# --------------------------------------------------------------------------
def _similarity_adj_self_kernel(yn_ref, adj_ref):
    # Single-tile path: yn (Cp, Np) bf16 -> adj (Np, Np) int8.
    yn = yn_ref[...]
    sim = jax.lax.dot_general(
        yn, yn,
        dimension_numbers=(((0,), (0,)), ((), ())),
        preferred_element_type=jnp.float32,
    )
    adj_ref[...] = (sim > 0.5).astype(adj_ref.dtype)


def _similarity_adj_kernel(yq_ref, yk_ref, adj_ref, *, tk, resident):
    # yq: (Cp, tq) bf16;  yk: (Cp, Np) (resident) or (Cp, tk) (streamed).
    if resident:
        k = pl.program_id(2)
        yk = yk_ref[:, pl.ds(pl.multiple_of(k * tk, 128), tk)]
    else:
        yk = yk_ref[...]
    sim = jax.lax.dot_general(
        yq_ref[...], yk,
        dimension_numbers=(((0,), (0,)), ((), ())),
        preferred_element_type=jnp.float32,
    )
    adj_ref[...] = (sim > 0.5).astype(adj_ref.dtype)


def similarity_adjacency_pallas(yn_bf16):
    """yn_bf16: (B, Cp, Np) bf16 normalized channel-major features.
    Returns (B, Np, Np) int8 adjacency (only [:, :N, :N] is meaningful)."""
    B, Cp, Np = yn_bf16.shape

    if Np <= 1024:
        # Whole normalized slab fits VMEM: read it from HBM once per batch and
        # emit one fully lane-dense (Np, Np) int8 store per batch.
        vmem_limit = _vmem_limit(2 * Cp * Np * 2, 2 * Np * Np, Np * Np * 4)
        return pl.pallas_call(
            _similarity_adj_self_kernel,
            out_shape=jax.ShapeDtypeStruct((B, Np, Np), jnp.int8),
            grid_spec=pltpu.PrefetchScalarGridSpec(
                num_scalar_prefetch=0,
                grid=(B,),
                in_specs=[
                    pl.BlockSpec((pl.Squeezed(), Cp, Np), lambda b: (b, 0, 0)),
                ],
                out_specs=pl.BlockSpec(
                    (pl.Squeezed(), Np, Np), lambda b: (b, 0, 0)
                ),
            ),
            compiler_params=pltpu.CompilerParams(
                dimension_semantics=("parallel",),
                vmem_limit_bytes=vmem_limit,
            ),
        )(yn_bf16)

    # Tiled path (Np is a multiple of 512 here).
    tq = tk = 512
    nq, nk = Np // tq, Np // tk
    resident_bytes = 2 * Cp * Np * 2                 # full key slab, 2 buffers
    base_bytes = 2 * Cp * tq * 2 + 2 * tq * tk + tq * tk * 4
    resident = (resident_bytes + base_bytes + (8 << 20)) <= (40 << 20)
    if resident:
        # Keys kept VMEM-resident across the whole (q, k) sweep: one key DMA
        # per batch instead of Np/tq full re-reads.
        key_spec = pl.BlockSpec((pl.Squeezed(), Cp, Np), lambda b, q, k: (b, 0, 0))
        key_bytes = resident_bytes
    else:
        # Streamed-key fallback for very large Np*Cp (v7x 64 MiB VMEM).
        # TODO(synk): pipeline_mode=pl.Buffered(3) on this spec would deepen
        # key prefetch on this fallback path.
        key_spec = pl.BlockSpec((pl.Squeezed(), Cp, tk), lambda b, q, k: (b, 0, k))
        key_bytes = 2 * Cp * tk * 2

    kernel = functools.partial(_similarity_adj_kernel, tk=tk, resident=resident)
    vmem_limit = _vmem_limit(2 * Cp * tq * 2, key_bytes, 2 * tq * tk, tq * tk * 4)
    return pl.pallas_call(
        kernel,
        out_shape=jax.ShapeDtypeStruct((B, Np, Np), jnp.int8),
        grid_spec=pltpu.PrefetchScalarGridSpec(
            num_scalar_prefetch=0,
            grid=(B, nq, nk),
            in_specs=[
                pl.BlockSpec((pl.Squeezed(), Cp, tq), lambda b, q, k: (b, 0, q)),
                key_spec,
            ],
            out_specs=pl.BlockSpec(
                (pl.Squeezed(), tq, tk), lambda b, q, k: (b, q, k)
            ),
        ),
        compiler_params=pltpu.CompilerParams(
            dimension_semantics=("parallel", "parallel", "parallel"),
            vmem_limit_bytes=vmem_limit,
        ),
    )(yn_bf16, yn_bf16)          # query / key roles of the same tensor


# --------------------------------------------------------------------------
# Host-side glue (community assignment, PCA) — mirrors the PyTorch module
# --------------------------------------------------------------------------
def fallback_communities(n_nodes, num_clusters):
    """Module's _fallback_clustering: contiguous equal splits of node ids."""
    if n_nodes <= num_clusters:
        return [[i] for i in range(n_nodes)]
    per = n_nodes // num_clusters
    comms = []
    for i in range(num_clusters):
        start = i * per
        end = start + per if i < num_clusters - 1 else n_nodes
        comms.append(list(range(start, end)))
    return comms


def communities_to_norm_assign(communities, n, k_pad):
    """(Kp, N) matrix whose row k is one-hot(community k) / |community k|."""
    a = np.zeros((k_pad, n), dtype=np.float32)
    for k, comm in enumerate(communities):
        if len(comm) == 0:
            continue
        w = 1.0 / float(len(comm))
        for node in comm:
            a[k, node] = w
    return jnp.asarray(a)


def apply_pca_like(clustered_bkc, target_dim):
    """Reproduce apply_pca: fit PCA on the FIRST batch's clustered features
    (the module lazily caches self.pca and reuses it; the reference fits
    sklearn PCA on CPU numpy), transform all batches, pad/truncate to
    target_dim."""
    B, K, C = clustered_bkc.shape
    max_components = min(K, C)
    tc = min(target_dim, max_components)
    if max_components <= 1 or tc <= 0:
        if C >= target_dim:
            return clustered_bkc[..., :target_dim]
        pad = jnp.zeros((B, K, target_dim - C), dtype=clustered_bkc.dtype)
        return jnp.concatenate([clustered_bkc, pad], axis=-1)

    x0 = np.asarray(clustered_bkc[0], dtype=np.float32)     # PCA fit data (host)
    mean_ = x0.mean(axis=0)
    # TODO(synk): sklearn's PCA applies svd_flip for a deterministic component
    # sign convention; components here may differ in sign.
    _, _, vt = np.linalg.svd(x0 - mean_, full_matrices=False)
    comps = jnp.asarray(vt[:tc])                             # (tc, C)
    reduced = jnp.einsum("bkc,tc->bkt",
                         clustered_bkc - jnp.asarray(mean_), comps)
    if tc < target_dim:
        pad = jnp.zeros((B, K, target_dim - tc), dtype=reduced.dtype)
        reduced = jnp.concatenate([reduced, pad], axis=-1)
    return reduced[..., :target_dim]


# --------------------------------------------------------------------------
# Forward pass
# --------------------------------------------------------------------------
def community_clustering_forward(feature_map, num_clusters=3, target_dim=256):
    """feature_map: (B, C, H, W) NCHW like PyTorch.

    Returns (clustered_features (B, num_clusters, target_dim), communities,
    adjacency_padded (B, Np, Np) int8 — only [:, :N, :N] is meaningful;
    consumers slice lazily to avoid an extra N^2 HBM copy)."""
    B, C, H, W = feature_map.shape
    N = H * W
    # (B, C, H, W) -> (B, C, N) is a pure view; the reference's permute(0,2,1)
    # is absorbed into the kernels' contraction dims (no host transpose pass).
    features_bcn = feature_map.reshape(B, C, N).astype(jnp.float32)

    Np = _choose_padded_n(N)
    Cp = _round_up(C, 128)
    Kp = max(8, _round_up(num_clusters, 8))

    # TODO(synk): Louvain community detection (networkx + python-louvain) is a
    # host-side data-dependent graph algorithm; use the module's deterministic
    # fallback clustering instead.
    communities = fallback_communities(N, num_clusters)
    a_norm = communities_to_norm_assign(communities, N, Kp)

    yn_bf16, means_pad = normalize_and_means_pallas(features_bcn, a_norm, Cp, Np)
    adj_pad = similarity_adjacency_pallas(yn_bf16)

    cluster_means = means_pad[:, :num_clusters, :C]          # (B, K, C)
    clustered_features = apply_pca_like(cluster_means, target_dim)
    batch_communities = [communities for _ in range(B)]
    return clustered_features, batch_communities, adj_pad


if __name__ == "__main__":
    key = jax.random.PRNGKey(0)
    B, C, H, W = 2, 32, 8, 8           # small shapes; N = H*W = 64
    num_clusters, target_dim = 3, 256

    feature_map = jax.random.normal(key, (B, C, H, W), dtype=jnp.float32)

    clustered, communities, adj_pad = community_clustering_forward(
        feature_map, num_clusters=num_clusters, target_dim=target_dim
    )
    clustered = jax.block_until_ready(clustered)
    adj_pad = jax.block_until_ready(adj_pad)

    N = H * W
    # shape checks
    assert clustered.shape == (B, num_clusters, target_dim)
    assert len(communities) == B and len(communities[0]) == num_clusters
    assert adj_pad.shape[0] == B and adj_pad.shape[1] >= N and adj_pad.shape[2] >= N

    adj = np.asarray(adj_pad)[:, :N, :N]        # lazy host-side view of real nodes

    # self-similarity of every real node is 1.0 > 0.5 -> diagonal must be 1
    diag = adj[:, np.arange(N), np.arange(N)]
    assert np.all(diag == 1)

    # f32 reference adjacency; bf16 MXU inputs may only flip edges whose true
    # cosine is within a small band of the 0.5 threshold.
    feats = np.asarray(feature_map).reshape(B, C, N).transpose(0, 2, 1)  # (B,N,C)
    nrm = np.maximum(np.linalg.norm(feats, axis=2, keepdims=True), 1e-12)
    fn = feats / nrm
    sim_ref = np.einsum("bnc,bmc->bnm", fn, fn)
    adj_ref = (sim_ref > 0.5).astype(np.int8)
    mismatch = adj != adj_ref
    assert np.all(np.abs(sim_ref[mismatch] - 0.5) < 0.02)

    # community means from kernel 1 match a pure-numpy reference
    Np = _choose_padded_n(N)
    Cp = _round_up(C, 128)
    Kp = max(8, _round_up(num_clusters, 8))
    a_norm = communities_to_norm_assign(communities[0], N, Kp)
    _, means_pad = normalize_and_means_pallas(
        jnp.asarray(feats.transpose(0, 2, 1)), a_norm, Cp, Np
    )
    ref_means = np.stack(
        [
            np.stack([feats[b][np.asarray(c)].mean(axis=0) for c in communities[b]])
            for b in range(B)
        ]
    )
    np.testing.assert_allclose(
        np.asarray(means_pad[:, :num_clusters, :C]), ref_means,
        rtol=1e-3, atol=1e-3,
    )

    print("KERNEL_OK")
</pallas_src>

<mosaic_0001>
module attributes {stable_mosaic.version = 11 : i64} {
  func.func @_normalize_means_kernel(%arg0: i32, %arg1: memref<1x32x64xf32, #tpu.memory_space<vmem>>, %arg2: memref<8x64xf32, #tpu.memory_space<vmem>>, %arg3: memref<1x128x128xbf16, #tpu.memory_space<vmem>>, %arg4: memref<1x8x128xf32, #tpu.memory_space<vmem>>) attributes {dimension_semantics = [#tpu.dimension_semantics<parallel>], iteration_bounds = array<i64: 2>, scalar_prefetch = 0 : i64, scratch_operands = 0 : i64, tpu.core_type = #tpu.core_type<tc>, window_params = [{transform_indices = @transform_0, window_bounds = array<i64: 1, 32, 64>}, {pipeline_mode = #tpu.pipeline_mode<synchronous>, transform_indices = @transform_1, window_bounds = array<i64: 8, 64>}, {transform_indices = @transform_2, window_bounds = array<i64: 1, 128, 128>}, {transform_indices = @transform_3, window_bounds = array<i64: 1, 8, 128>}]} {
    %c0 = arith.constant 0 : index
    %c0_0 = arith.constant 0 : index
    %c0_1 = arith.constant 0 : index
    %0 = vector.load %arg1[%c0, %c0_0, %c0_1] : memref<1x32x64xf32, #tpu.memory_space<vmem>>, vector<1x32x64xf32>
    %1 = vector.shape_cast %0 : vector<1x32x64xf32> to vector<32x64xf32>
    %2 = arith.mulf %1, %1 : vector<32x64xf32>
    %cst = arith.constant dense<0.000000e+00> : vector<64xf32>
    %3 = vector.multi_reduction <add>, %2, %cst [0] : vector<32x64xf32> to vector<64xf32>
    %4 = vector.shape_cast %3 : vector<64xf32> to vector<1x64xf32>
    %cst_2 = arith.constant 1.000000e-24 : f32
    %5 = vector.broadcast %cst_2 : f32 to vector<1x64xf32>
    %6 = arith.maximumf %4, %5 : vector<1x64xf32>
    %7 = math.rsqrt %6 : vector<1x64xf32>
    %cst_3 = arith.constant 0.000000e+00 : bf16
    %8 = vector.broadcast %cst_3 : bf16 to vector<128x128xbf16>
    %c0_4 = arith.constant 0 : index
    %c0_5 = arith.constant 0 : index
    %c0_6 = arith.constant 0 : index
    %9 = vector.load %arg3[%c0_4, %c0_5, %c0_6] : memref<1x128x128xbf16, #tpu.memory_space<vmem>>, vector<1x128x128xbf16>
    %10 = vector.shape_cast %9 : vector<1x128x128xbf16> to vector<128x128xbf16>
    %11 = vector.shape_cast %8 : vector<128x128xbf16> to vector<1x128x128xbf16>
    tpu.vector_store %arg3[%c0_4, %c0_5, %c0_6], %11 {strides = array<i32>} : memref<1x128x128xbf16, #tpu.memory_space<vmem>>, vector<1x128x128xbf16>,
    %12 = vector.broadcast %7 : vector<1x64xf32> to vector<32x64xf32>
    %13 = arith.mulf %1, %12 : vector<32x64xf32>
    %14 = arith.truncf %13 : vector<32x64xf32> to vector<32x64xbf16>
    %c0_7 = arith.constant 0 : index
    %c0_8 = arith.constant 0 : index
    %c0_9 = arith.constant 0 : index
    %15 = vector.load %arg3[%c0_7, %c0_8, %c0_9] : memref<1x128x128xbf16, #tpu.memory_space<vmem>>, vector<1x32x64xbf16>
    %16 = vector.shape_cast %15 : vector<1x32x64xbf16> to vector<32x64xbf16>
    %17 = vector.shape_cast %14 : vector<32x64xbf16> to vector<1x32x64xbf16>
    tpu.vector_store %arg3[%c0_7, %c0_8, %c0_9], %17 {strides = array<i32>} : memref<1x128x128xbf16, #tpu.memory_space<vmem>>, vector<1x32x64xbf16>,
    %c0_10 = arith.constant 0 : index
    %c0_11 = arith.constant 0 : index
    %18 = vector.load %arg2[%c0_10, %c0_11] : memref<8x64xf32, #tpu.memory_space<vmem>>, vector<8x64xf32>
    %cst_12 = arith.constant dense<0.000000e+00> : vector<8x32xf32>
    %19 = tpu.matmul %18, %1, %cst_12 {dimension_numbers = #tpu.dot_dimension_numbers<[1], [1], [0], [0], [0, 0, 1, 0], [], []>} : vector<8x64xf32>, vector<32x64xf32>, vector<8x32xf32> -> vector<8x32xf32>
    %cst_13 = arith.constant 0.000000e+00 : f32
    %20 = vector.broadcast %cst_13 : f32 to vector<8x128xf32>
    %c0_14 = arith.constant 0 : index
    %c0_15 = arith.constant 0 : index
    %c0_16 = arith.constant 0 : index
    %21 = vector.load %arg4[%c0_14, %c0_15, %c0_16] : memref<1x8x128xf32, #tpu.memory_space<vmem>>, vector<1x8x128xf32>
    %22 = vector.shape_cast %21 : vector<1x8x128xf32> to vector<8x128xf32>
    %23 = vector.shape_cast %20 : vector<8x128xf32> to vector<1x8x128xf32>
    tpu.vector_store %arg4[%c0_14, %c0_15, %c0_16], %23 {strides = array<i32>} : memref<1x8x128xf32, #tpu.memory_space<vmem>>, vector<1x8x128xf32>,
    %c0_17 = arith.constant 0 : index
    %c0_18 = arith.constant 0 : index
    %c0_19 = arith.constant 0 : index
    %24 = vector.load %arg4[%c0_17, %c0_18, %c0_19] : memref<1x8x128xf32, #tpu.memory_space<vmem>>, vector<1x8x32xf32>
    %25 = vector.shape_cast %24 : vector<1x8x32xf32> to vector<8x32xf32>
    %26 = vector.shape_cast %19 : vector<8x32xf32> to vector<1x8x32xf32>
    tpu.vector_store %arg4[%c0_17, %c0_18, %c0_19], %26 {strides = array<i32>} : memref<1x8x128xf32, #tpu.memory_space<vmem>>, vector<1x8x32xf32>,
    return
  }
  func.func @transform_0(%arg0: i32) -> (i32, i32, i32) {
    %c0_i32 = arith.constant 0 : i32
    %c0_i32_0 = arith.constant 0 : i32
    %c0_i32_1 = arith.constant 0 : i32
    return %arg0, %c0_i32, %c0_i32_0 : i32, i32, i32
  }
  func.func @transform_1(%arg0: i32) -> (i32, i32) {
    %c0_i32 = arith.constant 0 : i32
    %c0_i32_0 = arith.constant 0 : i32
    %c0_i32_1 = arith.constant 0 : i32
    return %c0_i32, %c0_i32_0 : i32, i32
  }
  func.func @transform_2(%arg0: i32) -> (i32, i32, i32) {
    %c0_i32 = arith.constant 0 : i32
    %c0_i32_0 = arith.constant 0 : i32
    %c0_i32_1 = arith.constant 0 : i32
    return %arg0, %c0_i32, %c0_i32_0 : i32, i32, i32
  }
  func.func @transform_3(%arg0: i32) -> (i32, i32, i32) {
    %c0_i32 = arith.constant 0 : i32
    %c0_i32_0 = arith.constant 0 : i32
    %c0_i32_1 = arith.constant 0 : i32
    return %arg0, %c0_i32, %c0_i32_0 : i32, i32, i32
  }
}

</mosaic_0001>

<bundles_post_ra>
// kernel: tpu_custom_call.1
= control target key start
LH: loop header
LB: loop body
LE: loop exit
PB: predicated region body
PF: predicated region fallthrough
CT: control target
= control target key end

     0   :  { %9 = vsyncpa [#allocation3], 0  ;;  %s954_s0 = inlined_call_operand.hbm [shape: f32[2,32,64], index: 0, kind: input, shape index: {}]   ;;  %s955_s1 = inlined_call_operand.hbm [shape: f32[8,64], index: 1, kind: input, shape index: {}]   ;;  %s956_s2 = inlined_call_operand.hbm [shape: bf16[2,128,128], index: 2, kind: output, shape index: {0}]   ;;  %s957_s3 = inlined_call_operand.hbm [shape: f32[2,8,128], index: 3, kind: output, shape index: {1}]  }
   0x1   :  { %11 = vsyncpa [#allocation3 + $0x1], 0 }
   0x2   :  { %12 = vsyncpa [#allocation6], 0 }
   0x3   :  { %13 = vsyncpa [#allocation4], 0 }
   0x4   :  { %15 = vsyncpa [#allocation4 + $0x1], 0 }
   0x5   :  { %16 = vsyncpa [#allocation9], 0 }
   0x6   :  { %18 = vsyncpa [#allocation9 + $0x1], 0  ;;  %s757_s12 = smov 0   ;;  %s759_s13 = smov 0  }
   0x7   :  { %s761_s14 = smov 0   ;;  %s763_s15 = smov 0  }
   0x8 LB: > { %s778_s16 = sadd.s32 4294967295, %s728_s15   ;;  %s470_s17 = sadd.s32 4294967294, %s728_s15   ;;  %s728_s15 = sphi %s763_s15, %s968_s15   ;;  %s724_s14 = sphi %s761_s14, %s967_s14   ;;  %s720_s13 = sphi %s759_s13, %s966_s13   ;;  %s716_s12 = sphi %s757_s12, %s965_s12  }
   0x9   : > { %s782_s18 = sadd.s32 1, %s728_s15   ;;  %s31_s19 = sadd.s32 1, %s724_s14 }
   0xa   : > { %s28_s20 = ssub.s32 %s728_s15, %s782_s18  ;;  %p38_p0 = scmp.ne.s32.totalorder %s724_s14, %s720_s13 }
   0xb   : > { %p29_p1 = scmp.eq.s32.totalorder %s28_s20, 0  ;;  %p39_p2 = scmp.eq.s32.totalorder %s728_s15, 0 }
   0xc   : > { %p44_p3 = scmp.ne.s32.totalorder %s720_s13, %s716_s12  ;;  %p45_p4 = scmp.eq.s32.totalorder %s778_s16, 0 }
   0xd   : > { %s794_s21 = scalar_select %p29_p1, %s724_s14, %s31_s19  }
   0xe   : > { %p796_p5 = por %p39_p2, %p38_p0  ;;  %p802_p6 = por %p45_p4, %p44_p3 }
   0xf   : > { %p89_p7 = scmp.eq.s32.totalorder %s778_s16, 1  ;;  %p95_p8 = scmp.eq.s32.totalorder %s470_s17, 1 }
  0x10   : > { %p471_p9 = scmp.ge.s32.totalorder %s728_s15, 1  ;;  %p128_p10 = scmp.lt.s32.totalorder %s728_s15, 3 }
  0x11   : > { %p809_p11 = por %p89_p7, %p38_p0  ;;  %p813_p12 = por %p95_p8, %p44_p3 }
  0x12   : > { %p817_p13 = pnand %p471_p9, %p128_p10  ;;  %s140_s29 = sshll.u32 %s955_s1, 4  ;;  %s141_s29 = int_to_ptr.hbm [resolvable:$true] %s140_s29 }
  0x13   : > { %s730_s30 = smov [#allocation5]   ;;  %p522_p3 = scmp.lt.s32.totalorder %s728_s15, 2 }
  0x14   : > { %p506_p1 = pneg %p817_p13  ;;  %s142_s4 = sshll.u32 %s730_s30, 4  ;;  %s143_s4 = int_to_ptr.vmem [resolvable:$true] %s142_s4 }
  0x15   : > { %s153_s5 = sand.u32 1, %s724_s14   ;;  %p833_p7 = pnand %p522_p3, %p796_p5 }
  0x16   : > { %p507_p2 = pnand %p506_p1, %p45_p4  ;;  %s474_s7 = sshll.u32 %s153_s5, 5 }
  0x17   : > { %s494_s8 = sshll.u32 %s728_s15, 5  ;;  %s157_s19 = scalar_lea.vmem [#allocation2], %s474_s7 }
  0x18   : > { %509 = dma.hbm_to_vmem [thread:$0]  (!%p507_p2), %s141_s29, 128, %s143_s4, [#allocation6]  }
  0x19   : > { %s162_s11 = scalar_lea.hbm %s954_s0, %s494_s8  ;;  %s165_s20 = sshll.u32 %s157_s19, 4  ;;  %s166_s20 = int_to_ptr.vmem [resolvable:$true] %s165_s20 }
  0x1a   : > { %s163_s17 = sshll.u32 %s162_s11, 4  ;;  %s154_s27 = scalar_lea.sflag [#allocation3], %s153_s5  ;;  %s164_s17 = int_to_ptr.hbm [resolvable:$true] %s163_s17 }
  0x1b   : > { %s596_s28 = sshra.s32 %s164_s17, 4  ;;  %p600_p8 = pneg %p833_p7  ;;  %s597_s28 = int_to_ptr.hbm [resolvable:$true] %s596_s28 }
  0x1c   : > { %s598_s22 = scalar_lea.hbm %s597_s28, 32  ;;  %s603_s4 = scalar_lea.hbm %s954_s0, 64 }
  0x1d   : > { %p599_p5 = scmp.ne.s32.totalorder %s597_s28, %s598_s22  ;;  %p604_p1 = scmp.lt.s32.totalorder %s597_s28, %s954_s0 }
  0x1e   : > { %p605_p2 = scmp.lt.s32.totalorder %s603_s4, %s598_s22 }
  0x1f   : > { %p601_p9 = pnand %p600_p8, %p599_p5 }
  0x20   : > { %p606_p3 = por %p605_p2, %p604_p1 }
  0x21   : > { %p602_p10 = pneg %p601_p9 }
  0x23   : > { %p607_p0 = pnand %p606_p3, %p602_p10 }
  0x25   : > { %610 = shalt.err (!%p607_p0)
}
  0x26   : > { %s731_s5 = smov 128   ;;  %s732_s7 = smov 8  }
  0x27   : > { %513 = dma.hbm_to_vmem [thread:$0]  (!%p833_p7), %s164_s17, 512, %s166_s20, %s154_s27, %s731_s5, %s731_s5, %s732_s7  }
  0x28   : > { %177 = sbr.rel (%p817_p13) target bundleno = 193 (0xc1), region = 28  ;;  %s854_s10 = sand.u32 (!%p817_p13), 1, %s720_s13  }
  0x29   : > { %s478_s11 = sshll.u32 (!%p817_p13), %s854_s10, 5  ;;  %s180_s19 = scalar_lea.sflag (!%p817_p13), [#allocation3], %s854_s10 }
  0x2a   : > { %s183_s28 = scalar_lea.vmem (!%p817_p13), [#allocation2], %s478_s11 }
  0x2d   : > { %699 = dma.done.wait (%p802_p6), %s180_s19, 512  }
  0x2e   : > { %701 = vsyncadd (%p802_p6), %s180_s19, 4294966784 }
  0x2f   : > { %703 = dma.done.wait (%p45_p4), [#allocation6], 128  }
  0x30   : > { %705 = vsyncadd (%p45_p4), [#allocation6], 4294967168  ;;  %vm226_vm0 = vcmask 523264   ;;  %v866_v0 = vld [vmem:[%s183_s28 + $0x18] sm:$0xff]  ;;  %v220_v1 = vld [vmem:[%s183_s28 + $0x10] sm:$0xff]  ;;  %s480_s23 = sshll.u32 %s854_s10, 6 }
  0x31   : > { %v219_v2 = vld [vmem:[%s183_s28 + $0x8] sm:$0xff]  ;;  %482 = vmatpush.xpose.msk.msra.mxu0 %vm226_vm0, %v866_v0  ;;  %v224_v3 = vmul.f32 %v220_v1, %v220_v1  ;;  %v218_v5 = vld [vmem:[%s183_s28] sm:$0xff]  ;;  %v225_v6 = vmul.f32 %v866_v0, %v866_v0  ;;  %s879_s26 = scalar_lea.vmem [#allocation7], %s480_s23  ;;  %v733_v16 = vmov 0   ;;  %s495_s6 = sshll.u32 %s778_s16, 6  ;;  %vm275_vm4 = vcmask 519168  }
  0x32   : > { %v223_v4 = vmul.f32 %v219_v2, %v219_v2  ;;  %v222_v7 = vmul.f32 %v218_v5, %v218_v5  ;;  %251 = vst [vmem:[%s879_s26] sm:$0xf] %v733_v16  ;;  %v280_v18 = vld [vmem:[#allocation5] sm:$0xff]  ;;  %s336_s27 = scalar_lea.hbm %s956_s2, %s495_s6  ;;  %s337_s22 = sshll.u32 %s879_s26, 4  ;;  %s338_s22 = int_to_ptr.vmem [resolvable:$true] %s337_s22 }
  0x33   : > { %v230_v9 = vsel %vm226_vm0, %v224_v3, 0.0  ;;  %v232_v12 = vsel %vm226_vm0, %v225_v6, 0.0  ;;  %252 = vst [vmem:[%s879_s26 + $0x4] sm:$0xf] %v733_v16  ;;  %s339_s29 = sshll.u32 %s336_s27, 4  ;;  %s320_s30 = scalar_lea.sflag [#allocation4], %s854_s10  ;;  %s340_s29 = int_to_ptr.hbm [resolvable:$true] %s339_s29 }
  0x34   : > { %v228_v8 = vsel %vm226_vm0, %v223_v4, 0.0  ;;  %v227_v10 = vsel %vm226_vm0, %v222_v7, 0.0  ;;  %253 = vst [vmem:[%s879_s26 + $0x8] sm:$0xf] %v733_v16  ;;  %s640_s4 = sshra.s32 %s340_s29, 4  ;;  %s646_s7 = scalar_lea.hbm %s956_s2, 128  ;;  %s641_s4 = int_to_ptr.hbm [resolvable:$true] %s640_s4 }
  0x35   : > { %483 = vmatpush.xpose.msk.msra.mxu0 %vm226_vm0, %v220_v1  ;;  %v229_v11 = vadd.f32 %v228_v8, %v227_v10  ;;  %254 = vst [vmem:[%s879_s26 + $0xc] sm:$0xf] %v733_v16  ;;  %s642_s9 = scalar_lea.hbm %s641_s4, 64  ;;  %p647_p0 = scmp.lt.s32.totalorder %s641_s4, %s956_s2 }
  0x36   : > { %255 = vst [vmem:[%s879_s26 + $0x10] sm:$0xf] %v733_v16  ;;  %p643_p4 = scmp.ne.s32.totalorder %s641_s4, %s642_s9  ;;  %p648_p7 = scmp.lt.s32.totalorder %s646_s7, %s642_s9 }
  0x37   : > { %v231_v13 = vadd.f32 %v230_v9, %v229_v11  ;;  %256 = vst [vmem:[%s879_s26 + $0x14] sm:$0xf] %v733_v16 }
  0x38   : > { %257 = vst [vmem:[%s879_s26 + $0x18] sm:$0xf] %v733_v16  ;;  %p644_p6 = pnand %p643_p4, %p809_p11  ;;  %p649_p5 = por %p648_p7, %p647_p0 }
  0x39   : > { %484 = vmatpush.xpose.msk.msra.mxu0 %vm226_vm0, %v219_v2  ;;  %v233_v14 = vadd.f32 %v232_v12, %v231_v13  ;;  %258 = vst [vmem:[%s879_s26 + $0x1c] sm:$0xf] %v733_v16 }
  0x3a   : > { %259 = vst [vmem:[%s879_s26 + $0x20] sm:$0xf] %v733_v16  ;;  %p645_p13 = pneg %p644_p6 }
  0x3b   : > { %v234_v15 = vrot.slane %v233_v14, 4  ;;  %260 = vst [vmem:[%s879_s26 + $0x24] sm:$0xf] %v733_v16 }
  0x3c   : > { %261 = vst [vmem:[%s879_s26 + $0x28] sm:$0xf] %v733_v16  ;;  %p650_p8 = pnand %p649_p5, %p645_p13 }
  0x3d   : > { %v235_v17 = vadd.f32 %v234_v15, %v233_v14  ;;  %485 = vmatpush.xpose.msk.msra.mxu0 %vm226_vm0, %v218_v5  ;;  %262 = vst [vmem:[%s879_s26 + $0x2c] sm:$0xf] %v733_v16 }
  0x3e   : > { %263 = vst [vmem:[%s879_s26 + $0x30] sm:$0xf] %v733_v16 }
  0x3f   : > { %v236_v19 = vrot.slane %v235_v17, 2  ;;  %264 = vst [vmem:[%s879_s26 + $0x34] sm:$0xf] %v733_v16 }
  0x40   : > { %486 = vmatmul.msk.f32.vlgmr.msra.gmra.mxu0 %vm226_vm0, %v280_v18  ;;  %265 = vst [vmem:[%s879_s26 + $0x38] sm:$0xf] %v733_v16 }
  0x41   : > { %v237_v20 = vadd.f32 %v236_v19, %v235_v17  ;;  %266 = vst [vmem:[%s879_s26 + $0x3c] sm:$0xf] %v733_v16 }
  0x43   : > { %v238_v21 = vrot.slane %v237_v20, 1 }
  0x45   : > { %v239_v22 = vadd.f32 %v238_v21, %v237_v20 }
  0x47   : > { %v240_v23 = vmax.f32 %v239_v22, 1e-24 }
  0x49   : > { %564 = vrsqrt.f32 %v240_v23  ;;  %vm247_vm1 = vweird.f32 %v240_v23 }
  0x4f   : > { %v565_v24 = vpop.eup %564 }
  0x50   : > { %v242_v25 = vmul.f32 %v565_v24, %v240_v23  ;;  %vm248_vm2 = vweird.f32 %v565_v24 }
  0x51   : > { %vm249_vm3 = vmor %vm247_vm1, %vm248_vm2 }
  0x52   : > { %v243_v26 = vmul.f32 %v565_v24, %v242_v25 }
  0x54   : > { %v244_v27 = vmul.f32 0.5, %v243_v26 }
  0x56   : > { %v245_v28 = vsub.f32 1.5, %v244_v27 }
  0x58   : > { %v246_v29 = vmul.f32 %v565_v24, %v245_v28 }
  0x5a   : > { %v250_v30 = vsel %vm249_vm3, %v565_v24, %v246_v29 }
  0x5b   : > { %v267_v31 = vmul.f32 %v250_v30, %v218_v5  ;;  %v268_v32 = vmul.f32 %v250_v30, %v219_v2  ;;  %v269_v33 = vmul.f32 %v250_v30, %v220_v1  ;;  %v270_v34 = vmul.f32 %v250_v30, %v866_v0 }
  0x5d   : > { %v271_v35 = vpack.c.bf16 %v267_v31, %v267_v31  ;;  %v272_v36 = vpack.c.bf16 %v268_v32, %v268_v32  ;;  %v273_v37 = vpack.c.bf16 %v269_v33, %v269_v33  ;;  %v274_v38 = vpack.c.bf16 %v270_v34, %v270_v34 }
  0x5f   : > { %276 = vst.msk [vmem:[%s879_s26] sm:$0xf] %vm275_vm4, %v271_v35 }
  0x60   : > { %277 = vst.msk [vmem:[%s879_s26 + $0x4] sm:$0xf] %vm275_vm4, %v272_v36 }
  0x61   : > { %278 = vst.msk [vmem:[%s879_s26 + $0x8] sm:$0xf] %vm275_vm4, %v273_v37 }
  0x62   : > { %279 = vst.msk [vmem:[%s879_s26 + $0xc] sm:$0xf] %vm275_vm4, %v274_v38 }
  0x63   : > { %653 = shalt.err (!%p650_p8)
}
  0x64   : > { %s734_s28 = smov 64   ;;  %s735_s23 = smov 4   ;;  %v736_v39 = vmov 0.0   ;;  %vm317_vm5 = vcmask 261120  }
  0x65   : > { %502 = dma.vmem_to_hbm [thread:$0]  (%p809_p11), %s338_s22, 1024, %s340_s29, %s320_s30, %s734_s28, %s734_s28, %s735_s23  }
  0x66   : > { %s481_s26 = sshll.u32 %s854_s10, 3  ;;  %s491_s17 = sshll.u32 %s778_s16, 3 }
  0x67   : > { %s216_s6 = scalar_lea.vmem [#allocation8], %s481_s26  ;;  %s352_s4 = scalar_lea.hbm %s957_s3, %s491_s17 }
  0x68   : > { %316 = vst [vmem:[%s216_s6] sm:$0xff] %v736_v39  ;;  %s354_s9 = sshll.u32 %s216_s6, 4  ;;  %s356_s8 = sshll.u32 %s352_s4, 4  ;;  %s355_s9 = int_to_ptr.vmem [resolvable:$true] %s354_s9  ;;  %s357_s8 = int_to_ptr.hbm [resolvable:$true] %s356_s8 }
  0x69   : > { %s325_s5 = scalar_lea.sflag [#allocation9], %s854_s10  ;;  %s668_s7 = sshra.s32 %s357_s8, 4  ;;  %s669_s7 = int_to_ptr.hbm [resolvable:$true] %s668_s7 }
  0x6a   : > { %s670_s22 = scalar_lea.hbm %s669_s7, 8  ;;  %s674_s30 = scalar_lea.hbm %s957_s3, 16 }
  0x6b   : > { %p671_p9 = scmp.ne.s32.totalorder %s669_s7, %s670_s22  ;;  %p675_p2 = scmp.lt.s32.totalorder %s669_s7, %s957_s3 }
  0x6c   : > { %p676_p3 = scmp.lt.s32.totalorder %s674_s30, %s670_s22 }
  0x6d   : > { %p672_p10 = pnand %p671_p9, %p809_p11 }
  0x6e   : > { %p677_p4 = por %p676_p3, %p675_p2 }
  0x6f   : > { %p673_p1 = pneg %p672_p10 }
  0x71   : > { %p678_p6 = pnand %p677_p4, %p673_p1 }
  0xbd   : > { %v313_v40 = vpop.f32.mrf.mxu0 }
  0xbe   : > { %318 = vst.msk [vmem:[%s216_s6] sm:$0xff] %vm317_vm5, %v313_v40 }
  0xbf   : > { %681 = shalt.err (!%p678_p6)
}
  0xc0   : > { %503 = dma.vmem_to_hbm [thread:$0]  (%p809_p11), %s355_s9, 128, %s357_s8, %s325_s5  }
  0xc1 PF: > { %s368_s10 = sand.u32 1, %s716_s12   ;;  %p964_p13 = scmp.ge.s32.totalorder %s728_s15, 2 }
  0xc2   : > { %s369_s28 = scalar_lea.sflag [#allocation4], %s368_s10 }
  0xc3   : > { %p515_p0 = pnand %p964_p13, %p813_p12 }
  0xc5   : > { %p516_p7 = pneg %p515_p0 }
  0xc7   : > { %707 = dma.done.wait (%p516_p7), %s369_s28, 1024  }
  0xc8   : > { %709 = vsyncadd (%p516_p7), %s369_s28, 4294966272  ;;  %s379_s23 = scalar_lea.sflag [#allocation9], %s368_s10 }
  0xc9   : > { %711 = dma.done.wait (%p516_p7), %s379_s23, 128  }
  0xca   : > { %713 = vsyncadd (%p516_p7), %s379_s23, 4294967168  ;;  %p21_p11 = scmp.ge.s32.totalorder %s782_s18, 4   ;;  %s965_s12 = smov %s720_s13 }
  0xcb   : > { %s966_s13 = smov %s724_s14  ;;  %s967_s14 = smov %s794_s21 }
  0xcc   : > { %s968_s15 = smov %s782_s18  ;;  %23 = sbr.rel (!%p21_p11) target bundleno = 8 (0x8), region = 94 }
  0xd1   :  { %385 = vsyncpa [#allocation3], 1 }
  0xd2   :  { %387 = vsyncpa [#allocation3 + $0x1], 1 }
  0xd3   :  { %388 = vsyncpa [#allocation6], 1 }
  0xd4   :  { %389 = vsyncpa [#allocation4], 1 }
  0xd5   :  { %391 = vsyncpa [#allocation4 + $0x1], 1 }
  0xd6   :  { %392 = vsyncpa [#allocation9], 1 }
  0xd7   :  { %394 = vsyncpa [#allocation9 + $0x1], 1 }

</bundles_post_ra>
